<compile_context>
chip_gen: v5e
topology: v5e:2x2
jax: 0.10.0
libtpu: 0.0.40
codegen_flags: <defaults>
</compile_context>

<pallas_src>
import jax
import jax.numpy as jnp
from jax.experimental import pallas as pl
from jax.experimental.pallas import tpu as pltpu


def _make_kernel(C: int, O: int, mxu: bool, lane_dense_out: bool):
    """Builds the fused kernel for static (C, O) and static layout/compute choices."""

    def kernel(x_ref, wb_ref, o_ref):
        # x_ref : (B, C, S)   input in its native layout (S on lanes, no relayout)
        # wb_ref: (O, C + 1)  pre-doubled weight with pre-doubled bias as last column
        # o_ref : (B, S, O)   (or (B, O, S) when lane_dense_out)
        x = x_ref[...]
        wb = wb_ref[...]
        w2 = wb[:, :C]          # (O, C) = 2 * W   (static slice, no extra DMA)
        b2 = wb[:, C:C + 1]     # (O, 1) = 2 * b

        if mxu:
            # Large contraction: MXU matmul with f32 accumulation.
            acc = jnp.einsum('oc,bcs->bos', w2, x,
                             preferred_element_type=jnp.float32) + b2
        else:
            # Tiny C: fully unrolled VPU broadcast-FMA chain.  The first FMA's
            # implicit broadcast of the (O,1) bias seeds the accumulator, so
            # there is no explicit broadcast_to vreg fill.
            acc = b2 + w2[:, 0:1] * x[:, 0:1, :]              # (B, O, S) f32
            for c in range(1, C):
                acc = acc + w2[:, c:c + 1] * x[:, c:c + 1, :]

        if lane_dense_out:
            o_ref[...] = acc.astype(o_ref.dtype)                       # (B, O, S)
        else:
            # Apply the module's permute(0, 2, 1) once, on the small result tile.
            o_ref[...] = jnp.swapaxes(acc, 1, 2).astype(o_ref.dtype)   # (B, S, O)

    return kernel


def make_fused_forward(w, b):
    """One-time module setup.

    Folds the trailing (v2 + v2) doubling into the fixed Linear parameters and
    merges weight + bias into a single VMEM operand so the per-call path has no
    wrapper-side scaling ops and one fewer input DMA.  Returns a jitted forward.
    """
    O, C = w.shape
    # Done exactly once here (module init), never per call.
    wb = jnp.concatenate(
        [2.0 * w.astype(jnp.float32),
         (2.0 * b.astype(jnp.float32)).reshape(O, 1)],
        axis=1,
    )  # (O, C + 1)

    @jax.jit
    def forward(x):
        B, Cx, S = x.shape
        assert Cx == C
        # Static compute-path choice: MXU only pays off for large contractions.
        mxu = (C >= 64) or (O >= 128)
        # Static output-layout choice: keep the accumulator-native, lane-dense
        # (B, O, S) layout when S is much wider than O (avoids a masked store at
        # O/128 lane utilization + an XLU transpose) and permute the result in
        # the wrapper.  At S ~ O it is a wash, so emit (B, S, O) directly.
        lane_dense_out = (S >= 128) and (S >= 8 * O)

        out_shape = (B, O, S) if lane_dense_out else (B, S, O)
        kernel = _make_kernel(C, O, mxu, lane_dense_out)

        out = pl.pallas_call(
            kernel,
            out_shape=jax.ShapeDtypeStruct(out_shape, x.dtype),
            in_specs=[
                pl.BlockSpec(memory_space=pltpu.MemorySpace.VMEM),
                pl.BlockSpec(memory_space=pltpu.MemorySpace.VMEM),
            ],
            out_specs=pl.BlockSpec(memory_space=pltpu.MemorySpace.VMEM),
        )(x, wb)
        # TODO(synk): if B*S grows (esp. v7x with 64 MiB VMEM / 2 TCs), switch to a
        # grid over B with tiled BlockSpecs and dimension_semantics=("parallel",).
        if lane_dense_out:
            out = jnp.transpose(out, (0, 2, 1))
        return out

    return forward


if __name__ == "__main__":
    key = jax.random.PRNGKey(0)
    kx, kw, kb = jax.random.split(key, 3)

    # Module shapes: Linear(2, 2); input x1 = randn(1, 2, 2)
    B, C, S, O = 1, 2, 2, 2
    x1 = jax.random.normal(kx, (B, C, S), dtype=jnp.float32)

    # Deterministic nn.Linear-style init: U(-1/sqrt(in), 1/sqrt(in))
    bound = 1.0 / (C ** 0.5)
    w = jax.random.uniform(kw, (O, C), minval=-bound, maxval=bound, dtype=jnp.float32)
    b = jax.random.uniform(kb, (O,), minval=-bound, maxval=bound, dtype=jnp.float32)

    forward = make_fused_forward(w, b)      # one-time setup: fold x2 + merge w/b
    out = jax.block_until_ready(forward(x1))

    # Reference check in plain JAX (AvgPool2d k=1/s=1 is the identity -> v4 + x3)
    v1 = jnp.transpose(x1, (0, 2, 1))
    v2 = v1 @ w.T + b
    ref = v2 + v2
    assert out.shape == (B, S, O)
    assert jnp.allclose(out, ref, atol=1e-5, rtol=1e-5)

    print("KERNEL_OK")
</pallas_src>

<mosaic_0001>
module attributes {stable_mosaic.version = 11 : i64} {
  func.func @kernel(%arg0: memref<1x2x2xf32, #tpu.memory_space<vmem>>, %arg1: memref<2x3xf32, #tpu.memory_space<vmem>>, %arg2: memref<1x2x2xf32, #tpu.memory_space<vmem>>) attributes {dimension_semantics = [], scalar_prefetch = 0 : i64, scratch_operands = 0 : i64, tpu.core_type = #tpu.core_type<tc>} {
    %c0 = arith.constant 0 : index
    %c0_0 = arith.constant 0 : index
    %c0_1 = arith.constant 0 : index
    %0 = vector.load %arg0[%c0, %c0_0, %c0_1] : memref<1x2x2xf32, #tpu.memory_space<vmem>>, vector<1x2x2xf32>
    %c0_2 = arith.constant 0 : index
    %c0_3 = arith.constant 0 : index
    %1 = vector.load %arg1[%c0_2, %c0_3] : memref<2x3xf32, #tpu.memory_space<vmem>>, vector<2x3xf32>
    %2 = vector.extract_strided_slice %1 {offsets = [0, 0], sizes = [2, 2], strides = [1, 1]} : vector<2x3xf32> to vector<2x2xf32>
    %3 = vector.extract_strided_slice %1 {offsets = [0, 2], sizes = [2, 1], strides = [1, 1]} : vector<2x3xf32> to vector<2x1xf32>
    %4 = vector.extract_strided_slice %2 {offsets = [0, 0], sizes = [2, 1], strides = [1, 1]} : vector<2x2xf32> to vector<2x1xf32>
    %5 = vector.extract_strided_slice %0 {offsets = [0, 0, 0], sizes = [1, 1, 2], strides = [1, 1, 1]} : vector<1x2x2xf32> to vector<1x1x2xf32>
    %6 = vector.shape_cast %4 : vector<2x1xf32> to vector<1x2x1xf32>
    %7 = vector.broadcast %6 : vector<1x2x1xf32> to vector<1x2x2xf32>
    %8 = vector.broadcast %5 : vector<1x1x2xf32> to vector<1x2x2xf32>
    %9 = arith.mulf %7, %8 : vector<1x2x2xf32>
    %10 = vector.shape_cast %3 : vector<2x1xf32> to vector<1x2x1xf32>
    %11 = vector.broadcast %10 : vector<1x2x1xf32> to vector<1x2x2xf32>
    %12 = arith.addf %11, %9 : vector<1x2x2xf32>
    %13 = vector.extract_strided_slice %2 {offsets = [0, 1], sizes = [2, 1], strides = [1, 1]} : vector<2x2xf32> to vector<2x1xf32>
    %14 = vector.extract_strided_slice %0 {offsets = [0, 1, 0], sizes = [1, 1, 2], strides = [1, 1, 1]} : vector<1x2x2xf32> to vector<1x1x2xf32>
    %15 = vector.shape_cast %13 : vector<2x1xf32> to vector<1x2x1xf32>
    %16 = vector.broadcast %15 : vector<1x2x1xf32> to vector<1x2x2xf32>
    %17 = vector.broadcast %14 : vector<1x1x2xf32> to vector<1x2x2xf32>
    %18 = arith.mulf %16, %17 : vector<1x2x2xf32>
    %19 = arith.addf %12, %18 : vector<1x2x2xf32>
    %20 = tpu.transpose %19, [0, 2, 1] : vector<1x2x2xf32> -> vector<1x2x2xf32>
    %c0_4 = arith.constant 0 : index
    %c0_5 = arith.constant 0 : index
    %c0_6 = arith.constant 0 : index
    %21 = vector.load %arg2[%c0_4, %c0_5, %c0_6] : memref<1x2x2xf32, #tpu.memory_space<vmem>>, vector<1x2x2xf32>
    tpu.vector_store %arg2[%c0_4, %c0_5, %c0_6], %20 {strides = array<i32>} : memref<1x2x2xf32, #tpu.memory_space<vmem>>, vector<1x2x2xf32>,
    return
  }
}

</mosaic_0001>

<bundles_post_ra>
// kernel: forward.1
= control target key start
LH: loop header
LB: loop body
LE: loop exit
PB: predicated region body
PF: predicated region fallthrough
CT: control target
= control target key end

     0   :  { %7 = vsyncpa [#allocation3], 0  ;;  %s232_s0 = inlined_call_operand.hbm [shape: f32[1,2,2], index: 0, kind: input, shape index: {}]   ;;  %s233_s1 = inlined_call_operand.hbm [shape: f32[2,3], index: 1, kind: input, shape index: {}]   ;;  %s234_s2 = inlined_call_operand.hbm [shape: f32[1,2,2], index: 2, kind: output, shape index: {}]  }
   0x1   :  { %8 = vsyncpa [#allocation6], 0 }
   0x2   :  { %9 = vsyncpa [#allocation4], 0  ;;  %s15_s11 = sshll.u32 %s232_s0, 4  ;;  %s202_s12 = smov [#allocation2]   ;;  %s16_s11 = int_to_ptr.hbm [resolvable:$true] %s15_s11 }
   0x3   :  { %s17_s13 = sshll.u32 %s202_s12, 4  ;;  %s26_s16 = sshll.u32 %s233_s1, 4  ;;  %s18_s13 = int_to_ptr.vmem [resolvable:$true] %s17_s13  ;;  %s27_s16 = int_to_ptr.hbm [resolvable:$true] %s26_s16 }
   0x4   :  { %20 = dma.hbm_to_vmem [thread:$0]  %s16_s11, 32, %s18_s13, [#allocation3]  }
   0x5   :  { %s203_s17 = smov [#allocation5]  }
   0x6   :  { %s28_s18 = sshll.u32 %s203_s17, 4  ;;  %s29_s18 = int_to_ptr.vmem [resolvable:$true] %s28_s18 }
   0x7   :  { %31 = dma.hbm_to_vmem [thread:$0]  %s27_s16, 32, %s29_s18, [#allocation6]  }
   0x8   :  { %196 = dma.done.wait [#allocation3], 32  }
   0x9   :  { %197 = vsyncadd [#allocation3], 4294967264 }
   0xa   :  { %198 = dma.done.wait [#allocation6], 32  }
   0xb   :  { %199 = vsyncadd [#allocation6], 4294967264  ;;  %v204_v0 = vmov 0   ;;  %v205_v1 = vmov 1   ;;  %v41_v2 = vld [vmem:[#allocation5] sm:$0x3] }
   0xc   :  { %120 = vset.pattern.permute.xlu0 %v204_v0  ;;  %122 = vset.pattern.permute.xlu1 %v205_v1  ;;  %v206_v3 = vmov 2   ;;  %v40_v5 = vld [vmem:[#allocation2] sm:$0x3]  ;;  %s207_s0 = smov [#allocation7]   ;;  %s102_s21 = sshll.u32 %s234_s2, 4  ;;  %vm93_vm0 = vcmask 9216   ;;  %s103_s21 = int_to_ptr.hbm [resolvable:$true] %s102_s21 }
   0xd   :  { %44 = vperm.xlu0 %120, %v41_v2   ;;  %55 = vperm.xlu1 %122, %v41_v2   ;;  %v47_v6 = vperm.slane %v40_v5, 0  ;;  %v58_v7 = vperm.slane %v40_v5, 1  ;;  %s100_s1 = sshll.u32 %s207_s0, 4  ;;  %s101_s1 = int_to_ptr.vmem [resolvable:$true] %s100_s1 }
  0x15   :  { %121 = vset.pattern.permute.xlu0 %v206_v3 }
  0x16   :  { %50 = vperm.xlu0 %121, %v41_v2  }
  0x1e   :  { %123 = vset.pattern.permute.xlu0 %v205_v1 }
  0x7f   :  { %v45_v4 = vpop.permute.xlu0 %44  ;;  %v56_v8 = vpop.permute.xlu1 %55 }
  0x80   :  { %v48_v9 = vmul.f32 %v47_v6, %v45_v4  ;;  %v59_v10 = vmul.f32 %v58_v7, %v56_v8 }
  0x88   :  { %v51_v11 = vpop.permute.xlu0 %50 }
  0x89   :  { %v53_v12 = vadd.f32 %v51_v11, %v48_v9 }
  0x8b   :  { %v60_v13 = vadd.f32 %v59_v10, %v53_v12 }
  0x8d   :  { %61 = vxpose.xlu1.b32.start.end [1/1] (short) (narrow) %v60_v13, 8 }
 0x131   :  { %v77_v14 = vpop.trf.xlu1 }
 0x132   :  { %94 = vst.msk [vmem:[#allocation7] sm:$0x3] %vm93_vm0, %v77_v14 }
 0x133   :  { %105 = dma.vmem_to_hbm [thread:$0]  %s101_s1, 32, %s103_s21, [#allocation4]  }
 0x134   :  { %200 = dma.done.wait [#allocation4], 32  }
 0x135   :  { %201 = vsyncadd [#allocation4], 4294967264 }
 0x136   :  { %110 = vsyncpa [#allocation3], 1 }
 0x137   :  { %111 = vsyncpa [#allocation6], 1 }
 0x138   :  { %112 = vsyncpa [#allocation4], 1 }

</bundles_post_ra>
